<compile_context>
chip_gen: v7x
topology: tpu7x:2x2x1
jax: 0.10.0
libtpu: 0.0.40
codegen_flags: <defaults>
</compile_context>

<pallas_src>
import math
import functools

import numpy as np
import jax
import jax.numpy as jnp
from jax.experimental import pallas as pl
from jax.experimental.pallas import tpu as pltpu


NEG_INF = -1e30  # large finite negative: avoids inf-inf NaNs in the online softmax


def _l2norm(v):
    # F.normalize(v, dim=-1): v / max(||v||, 1e-12)  ==  v * rsqrt(max(||v||^2, 1e-24))
    ss = jnp.sum(v * v, axis=-1, keepdims=True)
    return v * jax.lax.rsqrt(jnp.maximum(ss, 1e-24))


# ---------------------------------------------------------------------------
# Kernel 1: fused QKV projection + per-head L2 norm + qk_scaler + rotary
# ---------------------------------------------------------------------------
def qkv_rope_kernel(x_ref, cos_ref, sin_ref, wqkv_ref, qk_scale_ref,
                    q_ref, k_ref, v_ref, *, n_head, head_dim, q_extra_scale):
    H, D = n_head, head_dim
    C = H * D

    x = x_ref[0].astype(jnp.bfloat16)                               # (TS, C)
    # One fused QKV matmul on the MXU, fp32 accumulation.
    qkv = jnp.dot(x, wqkv_ref[...], preferred_element_type=jnp.float32)  # (TS, 3C)

    qs_k = qk_scale_ref[...]                                        # (1, D) f32
    qs_q = qs_k * q_extra_scale                                     # fold sqrt(D) into q
    cos = cos_ref[...]                                              # (TS, D) = [cos, cos]
    sin = sin_ref[...]                                              # (TS, D) = [sin, -sin]

    def rope(t):                                                    # t: (TS, D)
        rot = jnp.concatenate([t[:, D // 2:], t[:, :D // 2]], axis=-1)
        return t * cos + rot * sin

    # Static loop over heads: only cheap element-wise layout work (all matmul work was
    # fused above); results go straight to the head-major outputs, so nothing stays
    # live across heads and no value concatenation is needed.
    for h in range(H):
        q_h = qkv[:, h * D:(h + 1) * D]
        k_h = qkv[:, C + h * D:C + (h + 1) * D]
        v_h = qkv[:, 2 * C + h * D:2 * C + (h + 1) * D]
        q_ref[0, h] = rope(qs_q * _l2norm(q_h)).astype(jnp.bfloat16)
        k_ref[0, h] = rope(qs_k * _l2norm(k_h)).astype(jnp.bfloat16)
        v_ref[0, h] = v_h.astype(jnp.bfloat16)


# ---------------------------------------------------------------------------
# Kernel 2: causal flash attention (heads batched) + output projection (c_proj)
# ---------------------------------------------------------------------------
def flash_attn_kernel(q_ref, k_ref, v_ref, wo_ref, out_ref,
                      m_scr, l_scr, acc_scr, y_scr):
    H, TQ, D = q_ref.shape[1], q_ref.shape[2], q_ref.shape[3]
    TK = k_ref.shape[2]

    qi = pl.program_id(1)
    ki = pl.program_id(2)
    nk = pl.num_programs(2)

    q_start = qi * TQ
    k_start = ki * TK

    @pl.when(ki == 0)
    def _init():
        m_scr[...] = jnp.full(m_scr.shape, NEG_INF, jnp.float32)
        l_scr[...] = jnp.zeros(l_scr.shape, jnp.float32)
        acc_scr[...] = jnp.zeros(acc_scr.shape, jnp.float32)

    # Causal: skip KV tiles that lie entirely in the future of this query tile.
    @pl.when(k_start <= q_start + TQ - 1)
    def _update():
        qh = q_ref[0]                                               # (H, TQ, D) bf16
        kh = k_ref[0]                                               # (H, TK, D) bf16
        vh = v_ref[0]                                               # (H, TK, D) bf16

        # sm_scale was folded into q in stage 1.
        s = jnp.einsum('hqd,hkd->hqk', qh, kh,
                       preferred_element_type=jnp.float32)          # (H, TQ, TK)

        rows = q_start + jax.lax.broadcasted_iota(jnp.int32, (TQ, TK), 0)
        cols = k_start + jax.lax.broadcasted_iota(jnp.int32, (TQ, TK), 1)
        s = jnp.where((rows >= cols)[None], s, NEG_INF)

        m_prev = m_scr[...]                                         # (H, TQ, 1)
        m_new = jnp.maximum(m_prev, jnp.max(s, axis=-1, keepdims=True))
        alpha = jnp.exp(m_prev - m_new)
        p = jnp.exp(s - m_new)                                      # (H, TQ, TK)

        l_scr[...] = alpha * l_scr[...] + jnp.sum(p, axis=-1, keepdims=True)
        acc_scr[...] = alpha * acc_scr[...] + jnp.einsum(
            'hqk,hkd->hqd', p.astype(jnp.bfloat16), vh,
            preferred_element_type=jnp.float32)
        m_scr[...] = m_new

    @pl.when(ki == nk - 1)
    def _finalize():
        y = acc_scr[...] * pl.reciprocal(l_scr[...], approx=True)   # (H, TQ, D) f32
        # Merge heads via lane-slice stores into a lane-dense (TQ, C) slab
        # (no value concatenation), then one fused c_proj matmul.
        for h in range(H):
            y_scr[:, h * D:(h + 1) * D] = y[h].astype(jnp.bfloat16)
        out_ref[0] = jnp.dot(y_scr[...], wo_ref[...],
                             preferred_element_type=jnp.float32)


# ---------------------------------------------------------------------------
# Wrapper
# ---------------------------------------------------------------------------
def causal_self_attention(x, params, cos, sin, *, n_head,
                          block_seq=128, block_q=128, block_kv=128,
                          vmem_limit_bytes=48 * 1024 * 1024):
    B, T, C = x.shape
    assert C % n_head == 0
    H = n_head
    D = C // n_head

    TS = min(block_seq, T)
    TQ = min(block_q, T)
    TK = min(block_kv, T)
    assert T % TS == 0 and T % TQ == 0 and T % TK == 0

    # Full-width rotary tables: rope(t) = t * [cos, cos] + rot_half(t) * [sin, -sin]
    cos_f = jnp.concatenate([cos, cos], axis=-1).astype(jnp.float32)     # (T, D)
    sin_f = jnp.concatenate([sin, -sin], axis=-1).astype(jnp.float32)    # (T, D)

    # Fused QKV weight: one DMA stream / one MXU launch per sequence tile.
    wqkv = jnp.concatenate([params["wq"], params["wk"], params["wv"]],
                           axis=1).astype(jnp.bfloat16)                  # (C, 3C)
    wo = params["wo"].astype(jnp.bfloat16)                               # (C, C)
    qk_scale = params["qk_scale"].astype(jnp.float32).reshape(1, D)

    # ---- stage 1: QKV + norm + rope -> (B, H, T, D) bf16 ----
    qkv_fn = pl.pallas_call(
        functools.partial(qkv_rope_kernel, n_head=H, head_dim=D,
                          q_extra_scale=math.sqrt(D)),
        out_shape=(jax.ShapeDtypeStruct((B, H, T, D), jnp.bfloat16),
                   jax.ShapeDtypeStruct((B, H, T, D), jnp.bfloat16),
                   jax.ShapeDtypeStruct((B, H, T, D), jnp.bfloat16)),
        grid_spec=pltpu.PrefetchScalarGridSpec(
            num_scalar_prefetch=0,
            grid=(B, T // TS),
            in_specs=[
                pl.BlockSpec((1, TS, C), lambda b, t: (b, t, 0)),        # x tile
                pl.BlockSpec((TS, D), lambda b, t: (t, 0)),              # cos
                pl.BlockSpec((TS, D), lambda b, t: (t, 0)),              # sin
                pl.BlockSpec((C, 3 * C), lambda b, t: (0, 0)),           # Wqkv (resident)
                pl.BlockSpec((1, D), lambda b, t: (0, 0)),               # qk_scaler()
            ],
            out_specs=(
                pl.BlockSpec((1, H, TS, D), lambda b, t: (b, 0, t, 0)),
                pl.BlockSpec((1, H, TS, D), lambda b, t: (b, 0, t, 0)),
                pl.BlockSpec((1, H, TS, D), lambda b, t: (b, 0, t, 0)),
            ),
        ),
        compiler_params=pltpu.CompilerParams(
            dimension_semantics=("parallel", "parallel"),
            vmem_limit_bytes=vmem_limit_bytes),
    )
    q_rot, k_rot, v_h = qkv_fn(x, cos_f, sin_f, wqkv, qk_scale)

    # K/V index map clamped to the last causally-needed KV tile: when a KV tile lies
    # entirely in the future (body skipped by pl.when), the block index does not
    # change, so the pipeline issues no new DMA for it.
    def kv_index_map(b, q, k):
        k_last = ((q + 1) * TQ - 1) // TK
        return (b, 0, jnp.minimum(k, k_last), 0)

    # ---- stage 2: causal flash attention + c_proj ----
    attn_fn = pl.pallas_call(
        flash_attn_kernel,
        out_shape=jax.ShapeDtypeStruct((B, T, C), jnp.float32),
        grid_spec=pltpu.PrefetchScalarGridSpec(
            num_scalar_prefetch=0,
            grid=(B, T // TQ, T // TK),
            in_specs=[
                pl.BlockSpec((1, H, TQ, D), lambda b, q, k: (b, 0, q, 0)),  # Q tile
                pl.BlockSpec((1, H, TK, D), kv_index_map),                  # K tile
                pl.BlockSpec((1, H, TK, D), kv_index_map),                  # V tile
                pl.BlockSpec((C, C), lambda b, q, k: (0, 0)),               # Wo (resident)
            ],
            out_specs=pl.BlockSpec((1, TQ, C), lambda b, q, k: (b, q, 0)),
            scratch_shapes=[
                pltpu.VMEM((H, TQ, 1), jnp.float32),   # running max
                pltpu.VMEM((H, TQ, 1), jnp.float32),   # running denom
                pltpu.VMEM((H, TQ, D), jnp.float32),   # running accumulator
                pltpu.VMEM((TQ, C), jnp.bfloat16),     # merged-heads slab
            ],
        ),
        compiler_params=pltpu.CompilerParams(
            dimension_semantics=("parallel", "parallel", "arbitrary"),
            vmem_limit_bytes=vmem_limit_bytes),
    )
    return attn_fn(q_rot, k_rot, v_h, wo)


# ---------------------------------------------------------------------------
# Pure-JAX reference (mirrors the PyTorch module exactly, all f32)
# ---------------------------------------------------------------------------
def ref_attention(x, params, cos, sin, n_head):
    B, T, C = x.shape
    D = C // n_head

    def l2n(t):
        return t / jnp.maximum(jnp.sqrt(jnp.sum(t * t, -1, keepdims=True)), 1e-12)

    q = (x @ params["wq"]).reshape(B, T, n_head, D)
    k = (x @ params["wk"]).reshape(B, T, n_head, D)
    v = (x @ params["wv"]).reshape(B, T, n_head, D)
    qs = params["qk_scale"]                       # (1, D) broadcasts over (B,T,H,D)
    q = qs * l2n(q)
    k = qs * l2n(k)

    def rope(t):
        t1, t2 = t[..., :D // 2], t[..., D // 2:]
        c = cos[None, :, None, :]
        s = sin[None, :, None, :]
        return jnp.concatenate([t1 * c + t2 * s, -t1 * s + t2 * c], axis=-1)

    q, k = rope(q), rope(k)
    s_ = jnp.einsum("bthd,bshd->bhts", q, k) * math.sqrt(D)
    mask = jnp.tril(jnp.ones((T, T), bool))
    s_ = jnp.where(mask[None, None], s_, -jnp.inf)
    p = jax.nn.softmax(s_, axis=-1)
    y = jnp.einsum("bhts,bshd->bthd", p, v).reshape(B, T, C)
    return y @ params["wo"]


if __name__ == "__main__":
    # config: n_embd=32, n_head=4 (head_dim=8), seq=32, batch=2
    B, T, n_embd, n_head = 2, 32, 32, 4
    D = n_embd // n_head

    key = jax.random.PRNGKey(0)
    ks = jax.random.split(key, 6)

    def linear_w(k, fan_in, fan_out):
        # PyTorch nn.Linear default init, stored transposed (in, out)
        bound = 1.0 / math.sqrt(fan_in)
        return jax.random.uniform(k, (fan_in, fan_out), jnp.float32, -bound, bound)

    params = {
        "wq": linear_w(ks[0], n_embd, n_embd),
        "wk": linear_w(ks[1], n_embd, n_embd),
        "wv": linear_w(ks[2], n_embd, n_embd),
        "wo": linear_w(ks[3], n_embd, n_embd),
        # qk_scaler() is ones(head_dim) at init; perturb slightly so the
        # per-dimension broadcast is actually exercised.
        "qk_scale": 1.0 + 0.05 * jax.random.normal(ks[4], (1, D), jnp.float32),
    }

    # Rotary cos/sin (torch module caches them as bfloat16).
    inv_freq = 1.0 / (10000.0 ** (np.arange(0, D, 2, dtype=np.float32) / D))
    t = np.arange(T, dtype=np.float32)
    freqs = np.outer(t, inv_freq)                               # (T, D//2)
    cos = jnp.asarray(np.cos(freqs)).astype(jnp.bfloat16).astype(jnp.float32)
    sin = jnp.asarray(np.sin(freqs)).astype(jnp.bfloat16).astype(jnp.float32)

    x = jax.random.normal(ks[5], (B, T, n_embd), jnp.float32)

    # Small tiles so the demo exercises multiple sequence / q / kv tiles
    # (including the online-softmax accumulation, the causal tile skip, and the
    # clamped K/V index map).
    out = causal_self_attention(x, params, cos, sin, n_head=n_head,
                                block_seq=16, block_q=16, block_kv=16)
    jax.block_until_ready(out)

    ref = ref_attention(x, params, cos, sin, n_head)
    np.testing.assert_allclose(np.asarray(out), np.asarray(ref),
                               rtol=2e-2, atol=2e-2)
    print("KERNEL_OK")
</pallas_src>

<mosaic_0001>
module attributes {stable_mosaic.version = 11 : i64} {
  func.func @qkv_rope_kernel(%arg0: i32, %arg1: i32, %arg2: memref<1x16x32xf32, #tpu.memory_space<vmem>>, %arg3: memref<16x8xf32, #tpu.memory_space<vmem>>, %arg4: memref<16x8xf32, #tpu.memory_space<vmem>>, %arg5: memref<32x96xbf16, #tpu.memory_space<vmem>>, %arg6: memref<1x8xf32, #tpu.memory_space<vmem>>, %arg7: memref<1x4x16x8xbf16, #tpu.memory_space<vmem>>, %arg8: memref<1x4x16x8xbf16, #tpu.memory_space<vmem>>, %arg9: memref<1x4x16x8xbf16, #tpu.memory_space<vmem>>) attributes {dimension_semantics = [#tpu.dimension_semantics<parallel>, #tpu.dimension_semantics<parallel>], iteration_bounds = array<i64: 2, 2>, scalar_prefetch = 0 : i64, scratch_operands = 0 : i64, tpu.core_type = #tpu.core_type<tc>, window_params = [{transform_indices = @transform_0, window_bounds = array<i64: 1, 16, 32>}, {transform_indices = @transform_1, window_bounds = array<i64: 16, 8>}, {transform_indices = @transform_2, window_bounds = array<i64: 16, 8>}, {pipeline_mode = #tpu.pipeline_mode<synchronous>, transform_indices = @transform_3, window_bounds = array<i64: 32, 96>}, {pipeline_mode = #tpu.pipeline_mode<synchronous>, transform_indices = @transform_4, window_bounds = array<i64: 1, 8>}, {transform_indices = @transform_5, window_bounds = array<i64: 1, 4, 16, 8>}, {transform_indices = @transform_6, window_bounds = array<i64: 1, 4, 16, 8>}, {transform_indices = @transform_7, window_bounds = array<i64: 1, 4, 16, 8>}]} {
    %c0 = arith.constant 0 : index
    %c0_0 = arith.constant 0 : index
    %c0_1 = arith.constant 0 : index
    %0 = vector.load %arg2[%c0, %c0_0, %c0_1] : memref<1x16x32xf32, #tpu.memory_space<vmem>>, vector<1x16x32xf32>
    %1 = vector.shape_cast %0 : vector<1x16x32xf32> to vector<16x32xf32>
    %2 = arith.truncf %1 : vector<16x32xf32> to vector<16x32xbf16>
    %c0_2 = arith.constant 0 : index
    %c0_3 = arith.constant 0 : index
    %3 = vector.load %arg5[%c0_2, %c0_3] : memref<32x96xbf16, #tpu.memory_space<vmem>>, vector<32x96xbf16>
    %cst = arith.constant dense<0.000000e+00> : vector<16x96xf32>
    %4 = tpu.matmul %2, %3, %cst {dimension_numbers = #tpu.dot_dimension_numbers<[1], [0], [0], [1], [0, 0, 1, 1], [], []>} : vector<16x32xbf16>, vector<32x96xbf16>, vector<16x96xf32> -> vector<16x96xf32>
    %c0_4 = arith.constant 0 : index
    %c0_5 = arith.constant 0 : index
    %5 = vector.load %arg6[%c0_4, %c0_5] : memref<1x8xf32, #tpu.memory_space<vmem>>, vector<1x8xf32>
    %cst_6 = arith.constant 2.82842708 : f32
    %6 = vector.broadcast %cst_6 : f32 to vector<1x8xf32>
    %7 = arith.mulf %5, %6 : vector<1x8xf32>
    %c0_7 = arith.constant 0 : index
    %c0_8 = arith.constant 0 : index
    %8 = vector.load %arg3[%c0_7, %c0_8] : memref<16x8xf32, #tpu.memory_space<vmem>>, vector<16x8xf32>
    %c0_9 = arith.constant 0 : index
    %c0_10 = arith.constant 0 : index
    %9 = vector.load %arg4[%c0_9, %c0_10] : memref<16x8xf32, #tpu.memory_space<vmem>>, vector<16x8xf32>
    %10 = vector.extract_strided_slice %4 {offsets = [0, 0], sizes = [16, 8], strides = [1, 1]} : vector<16x96xf32> to vector<16x8xf32>
    %11 = vector.extract_strided_slice %4 {offsets = [0, 32], sizes = [16, 8], strides = [1, 1]} : vector<16x96xf32> to vector<16x8xf32>
    %12 = vector.extract_strided_slice %4 {offsets = [0, 64], sizes = [16, 8], strides = [1, 1]} : vector<16x96xf32> to vector<16x8xf32>
    %13 = arith.mulf %10, %10 : vector<16x8xf32>
    %cst_11 = arith.constant dense<0.000000e+00> : vector<16xf32>
    %14 = vector.multi_reduction <add>, %13, %cst_11 [1] : vector<16x8xf32> to vector<16xf32>
    %15 = vector.shape_cast %14 : vector<16xf32> to vector<16x1xf32>
    %cst_12 = arith.constant 1.000000e-24 : f32
    %16 = vector.broadcast %cst_12 : f32 to vector<16x1xf32>
    %17 = arith.maximumf %15, %16 : vector<16x1xf32>
    %18 = math.rsqrt %17 : vector<16x1xf32>
    %19 = vector.broadcast %18 : vector<16x1xf32> to vector<16x8xf32>
    %20 = arith.mulf %10, %19 : vector<16x8xf32>
    %21 = vector.broadcast %7 : vector<1x8xf32> to vector<16x8xf32>
    %22 = arith.mulf %21, %20 : vector<16x8xf32>
    %23 = vector.extract_strided_slice %22 {offsets = [0, 4], sizes = [16, 4], strides = [1, 1]} : vector<16x8xf32> to vector<16x4xf32>
    %24 = vector.extract_strided_slice %22 {offsets = [0, 0], sizes = [16, 4], strides = [1, 1]} : vector<16x8xf32> to vector<16x4xf32>
    %25 = tpu.concatenate %23, %24 in 1 : vector<16x4xf32>, vector<16x4xf32> -> vector<16x8xf32>
    %26 = arith.mulf %22, %8 : vector<16x8xf32>
    %27 = arith.mulf %25, %9 : vector<16x8xf32>
    %28 = arith.addf %26, %27 : vector<16x8xf32>
    %29 = arith.truncf %28 : vector<16x8xf32> to vector<16x8xbf16>
    %c0_13 = arith.constant 0 : index
    %c0_14 = arith.constant 0 : index
    %c0_15 = arith.constant 0 : index
    %c0_16 = arith.constant 0 : index
    %30 = vector.load %arg7[%c0_13, %c0_14, %c0_15, %c0_16] : memref<1x4x16x8xbf16, #tpu.memory_space<vmem>>, vector<1x1x16x8xbf16>
    %31 = vector.shape_cast %30 : vector<1x1x16x8xbf16> to vector<16x8xbf16>
    %32 = vector.shape_cast %29 : vector<16x8xbf16> to vector<1x1x16x8xbf16>
    tpu.vector_store %arg7[%c0_13, %c0_14, %c0_15, %c0_16], %32 {strides = array<i32>} : memref<1x4x16x8xbf16, #tpu.memory_space<vmem>>, vector<1x1x16x8xbf16>,
    %33 = arith.mulf %11, %11 : vector<16x8xf32>
    %cst_17 = arith.constant dense<0.000000e+00> : vector<16xf32>
    %34 = vector.multi_reduction <add>, %33, %cst_17 [1] : vector<16x8xf32> to vector<16xf32>
    %35 = vector.shape_cast %34 : vector<16xf32> to vector<16x1xf32>
    %cst_18 = arith.constant 1.000000e-24 : f32
    %36 = vector.broadcast %cst_18 : f32 to vector<16x1xf32>
    %37 = arith.maximumf %35, %36 : vector<16x1xf32>
    %38 = math.rsqrt %37 : vector<16x1xf32>
    %39 = vector.broadcast %38 : vector<16x1xf32> to vector<16x8xf32>
    %40 = arith.mulf %11, %39 : vector<16x8xf32>
    %41 = vector.broadcast %5 : vector<1x8xf32> to vector<16x8xf32>
    %42 = arith.mulf %41, %40 : vector<16x8xf32>
    %43 = vector.extract_strided_slice %42 {offsets = [0, 4], sizes = [16, 4], strides = [1, 1]} : vector<16x8xf32> to vector<16x4xf32>
    %44 = vector.extract_strided_slice %42 {offsets = [0, 0], sizes = [16, 4], strides = [1, 1]} : vector<16x8xf32> to vector<16x4xf32>
    %45 = tpu.concatenate %43, %44 in 1 : vector<16x4xf32>, vector<16x4xf32> -> vector<16x8xf32>
    %46 = arith.mulf %42, %8 : vector<16x8xf32>
    %47 = arith.mulf %45, %9 : vector<16x8xf32>
    %48 = arith.addf %46, %47 : vector<16x8xf32>
    %49 = arith.truncf %48 : vector<16x8xf32> to vector<16x8xbf16>
    %c0_19 = arith.constant 0 : index
    %c0_20 = arith.constant 0 : index
    %c0_21 = arith.constant 0 : index
    %c0_22 = arith.constant 0 : index
    %50 = vector.load %arg8[%c0_19, %c0_20, %c0_21, %c0_22] : memref<1x4x16x8xbf16, #tpu.memory_space<vmem>>, vector<1x1x16x8xbf16>
    %51 = vector.shape_cast %50 : vector<1x1x16x8xbf16> to vector<16x8xbf16>
    %52 = vector.shape_cast %49 : vector<16x8xbf16> to vector<1x1x16x8xbf16>
    tpu.vector_store %arg8[%c0_19, %c0_20, %c0_21, %c0_22], %52 {strides = array<i32>} : memref<1x4x16x8xbf16, #tpu.memory_space<vmem>>, vector<1x1x16x8xbf16>,
    %53 = arith.truncf %12 : vector<16x8xf32> to vector<16x8xbf16>
    %c0_23 = arith.constant 0 : index
    %c0_24 = arith.constant 0 : index
    %c0_25 = arith.constant 0 : index
    %c0_26 = arith.constant 0 : index
    %54 = vector.load %arg9[%c0_23, %c0_24, %c0_25, %c0_26] : memref<1x4x16x8xbf16, #tpu.memory_space<vmem>>, vector<1x1x16x8xbf16>
    %55 = vector.shape_cast %54 : vector<1x1x16x8xbf16> to vector<16x8xbf16>
    %56 = vector.shape_cast %53 : vector<16x8xbf16> to vector<1x1x16x8xbf16>
    tpu.vector_store %arg9[%c0_23, %c0_24, %c0_25, %c0_26], %56 {strides = array<i32>} : memref<1x4x16x8xbf16, #tpu.memory_space<vmem>>, vector<1x1x16x8xbf16>,
    %57 = vector.extract_strided_slice %4 {offsets = [0, 8], sizes = [16, 8], strides = [1, 1]} : vector<16x96xf32> to vector<16x8xf32>
    %58 = vector.extract_strided_slice %4 {offsets = [0, 40], sizes = [16, 8], strides = [1, 1]} : vector<16x96xf32> to vector<16x8xf32>
    %59 = vector.extract_strided_slice %4 {offsets = [0, 72], sizes = [16, 8], strides = [1, 1]} : vector<16x96xf32> to vector<16x8xf32>
    %60 = arith.mulf %57, %57 : vector<16x8xf32>
    %cst_27 = arith.constant dense<0.000000e+00> : vector<16xf32>
    %61 = vector.multi_reduction <add>, %60, %cst_27 [1] : vector<16x8xf32> to vector<16xf32>
    %62 = vector.shape_cast %61 : vector<16xf32> to vector<16x1xf32>
    %cst_28 = arith.constant 1.000000e-24 : f32
    %63 = vector.broadcast %cst_28 : f32 to vector<16x1xf32>
    %64 = arith.maximumf %62, %63 : vector<16x1xf32>
    %65 = math.rsqrt %64 : vector<16x1xf32>
    %66 = vector.broadcast %65 : vector<16x1xf32> to vector<16x8xf32>
    %67 = arith.mulf %57, %66 : vector<16x8xf32>
    %68 = vector.broadcast %7 : vector<1x8xf32> to vector<16x8xf32>
    %69 = arith.mulf %68, %67 : vector<16x8xf32>
    %70 = vector.extract_strided_slice %69 {offsets = [0, 4], sizes = [16, 4], strides = [1, 1]} : vector<16x8xf32> to vector<16x4xf32>
    %71 = vector.extract_strided_slice %69 {offsets = [0, 0], sizes = [16, 4], strides = [1, 1]} : vector<16x8xf32> to vector<16x4xf32>
    %72 = tpu.concatenate %70, %71 in 1 : vector<16x4xf32>, vector<16x4xf32> -> vector<16x8xf32>
    %73 = arith.mulf %69, %8 : vector<16x8xf32>
    %74 = arith.mulf %72, %9 : vector<16x8xf32>
    %75 = arith.addf %73, %74 : vector<16x8xf32>
    %76 = arith.truncf %75 : vector<16x8xf32> to vector<16x8xbf16>
    %c0_29 = arith.constant 0 : index
    %c1 = arith.constant 1 : index
    %c0_30 = arith.constant 0 : index
    %c0_31 = arith.constant 0 : index
    %77 = vector.load %arg7[%c0_29, %c1, %c0_30, %c0_31] : memref<1x4x16x8xbf16, #tpu.memory_space<vmem>>, vector<1x1x16x8xbf16>
    %78 = vector.shape_cast %77 : vector<1x1x16x8xbf16> to vector<16x8xbf16>
    %79 = vector.shape_cast %76 : vector<16x8xbf16> to vector<1x1x16x8xbf16>
    tpu.vector_store %arg7[%c0_29, %c1, %c0_30, %c0_31], %79 {strides = array<i32>} : memref<1x4x16x8xbf16, #tpu.memory_space<vmem>>, vector<1x1x16x8xbf16>,
    %80 = arith.mulf %58, %58 : vector<16x8xf32>
    %cst_32 = arith.constant dense<0.000000e+00> : vector<16xf32>
    %81 = vector.multi_reduction <add>, %80, %cst_32 [1] : vector<16x8xf32> to vector<16xf32>
    %82 = vector.shape_cast %81 : vector<16xf32> to vector<16x1xf32>
    %cst_33 = arith.constant 1.000000e-24 : f32
    %83 = vector.broadcast %cst_33 : f32 to vector<16x1xf32>
    %84 = arith.maximumf %82, %83 : vector<16x1xf32>
    %85 = math.rsqrt %84 : vector<16x1xf32>
    %86 = vector.broadcast %85 : vector<16x1xf32> to vector<16x8xf32>
    %87 = arith.mulf %58, %86 : vector<16x8xf32>
    %88 = vector.broadcast %5 : vector<1x8xf32> to vector<16x8xf32>
    %89 = arith.mulf %88, %87 : vector<16x8xf32>
    %90 = vector.extract_strided_slice %89 {offsets = [0, 4], sizes = [16, 4], strides = [1, 1]} : vector<16x8xf32> to vector<16x4xf32>
    %91 = vector.extract_strided_slice %89 {offsets = [0, 0], sizes = [16, 4], strides = [1, 1]} : vector<16x8xf32> to vector<16x4xf32>
    %92 = tpu.concatenate %90, %91 in 1 : vector<16x4xf32>, vector<16x4xf32> -> vector<16x8xf32>
    %93 = arith.mulf %89, %8 : vector<16x8xf32>
    %94 = arith.mulf %92, %9 : vector<16x8xf32>
    %95 = arith.addf %93, %94 : vector<16x8xf32>
    %96 = arith.truncf %95 : vector<16x8xf32> to vector<16x8xbf16>
    %c0_34 = arith.constant 0 : index
    %c1_35 = arith.constant 1 : index
    %c0_36 = arith.constant 0 : index
    %c0_37 = arith.constant 0 : index
    %97 = vector.load %arg8[%c0_34, %c1_35, %c0_36, %c0_37] : memref<1x4x16x8xbf16, #tpu.memory_space<vmem>>, vector<1x1x16x8xbf16>
    %98 = vector.shape_cast %97 : vector<1x1x16x8xbf16> to vector<16x8xbf16>
    %99 = vector.shape_cast %96 : vector<16x8xbf16> to vector<1x1x16x8xbf16>
    tpu.vector_store %arg8[%c0_34, %c1_35, %c0_36, %c0_37], %99 {strides = array<i32>} : memref<1x4x16x8xbf16, #tpu.memory_space<vmem>>, vector<1x1x16x8xbf16>,
    %100 = arith.truncf %59 : vector<16x8xf32> to vector<16x8xbf16>
    %c0_38 = arith.constant 0 : index
    %c1_39 = arith.constant 1 : index
    %c0_40 = arith.constant 0 : index
    %c0_41 = arith.constant 0 : index
    %101 = vector.load %arg9[%c0_38, %c1_39, %c0_40, %c0_41] : memref<1x4x16x8xbf16, #tpu.memory_space<vmem>>, vector<1x1x16x8xbf16>
    %102 = vector.shape_cast %101 : vector<1x1x16x8xbf16> to vector<16x8xbf16>
    %103 = vector.shape_cast %100 : vector<16x8xbf16> to vector<1x1x16x8xbf16>
    tpu.vector_store %arg9[%c0_38, %c1_39, %c0_40, %c0_41], %103 {strides = array<i32>} : memref<1x4x16x8xbf16, #tpu.memory_space<vmem>>, vector<1x1x16x8xbf16>,
    %104 = vector.extract_strided_slice %4 {offsets = [0, 16], sizes = [16, 8], strides = [1, 1]} : vector<16x96xf32> to vector<16x8xf32>
    %105 = vector.extract_strided_slice %4 {offsets = [0, 48], sizes = [16, 8], strides = [1, 1]} : vector<16x96xf32> to vector<16x8xf32>
    %106 = vector.extract_strided_slice %4 {offsets = [0, 80], sizes = [16, 8], strides = [1, 1]} : vector<16x96xf32> to vector<16x8xf32>
    %107 = arith.mulf %104, %104 : vector<16x8xf32>
    %cst_42 = arith.constant dense<0.000000e+00> : vector<16xf32>
    %108 = vector.multi_reduction <add>, %107, %cst_42 [1] : vector<16x8xf32> to vector<16xf32>
    %109 = vector.shape_cast %108 : vector<16xf32> to vector<16x1xf32>
    %cst_43 = arith.constant 1.000000e-24 : f32
    %110 = vector.broadcast %cst_43 : f32 to vector<16x1xf32>
    %111 = arith.maximumf %109, %110 : vector<16x1xf32>
    %112 = math.rsqrt %111 : vector<16x1xf32>
    %113 = vector.broadcast %112 : vector<16x1xf32> to vector<16x8xf32>
    %114 = arith.mulf %104, %113 : vector<16x8xf32>
    %115 = vector.broadcast %7 : vector<1x8xf32> to vector<16x8xf32>
    %116 = arith.mulf %115, %114 : vector<16x8xf32>
    %117 = vector.extract_strided_slice %116 {offsets = [0, 4], sizes = [16, 4], strides = [1, 1]} : vector<16x8xf32> to vector<16x4xf32>
    %118 = vector.extract_strided_slice %116 {offsets = [0, 0], sizes = [16, 4], strides = [1, 1]} : vector<16x8xf32> to vector<16x4xf32>
    %119 = tpu.concatenate %117, %118 in 1 : vector<16x4xf32>, vector<16x4xf32> -> vector<16x8xf32>
    %120 = arith.mulf %116, %8 : vector<16x8xf32>
    %121 = arith.mulf %119, %9 : vector<16x8xf32>
    %122 = arith.addf %120, %121 : vector<16x8xf32>
    %123 = arith.truncf %122 : vector<16x8xf32> to vector<16x8xbf16>
    %c0_44 = arith.constant 0 : index
    %c2 = arith.constant 2 : index
    %c0_45 = arith.constant 0 : index
    %c0_46 = arith.constant 0 : index
    %124 = vector.load %arg7[%c0_44, %c2, %c0_45, %c0_46] : memref<1x4x16x8xbf16, #tpu.memory_space<vmem>>, vector<1x1x16x8xbf16>
    %125 = vector.shape_cast %124 : vector<1x1x16x8xbf16> to vector<16x8xbf16>
    %126 = vector.shape_cast %123 : vector<16x8xbf16> to vector<1x1x16x8xbf16>
    tpu.vector_store %arg7[%c0_44, %c2, %c0_45, %c0_46], %126 {strides = array<i32>} : memref<1x4x16x8xbf16, #tpu.memory_space<vmem>>, vector<1x1x16x8xbf16>,
    %127 = arith.mulf %105, %105 : vector<16x8xf32>
    %cst_47 = arith.constant dense<0.000000e+00> : vector<16xf32>
    %128 = vector.multi_reduction <add>, %127, %cst_47 [1] : vector<16x8xf32> to vector<16xf32>
    %129 = vector.shape_cast %128 : vector<16xf32> to vector<16x1xf32>
    %cst_48 = arith.constant 1.000000e-24 : f32
    %130 = vector.broadcast %cst_48 : f32 to vector<16x1xf32>
    %131 = arith.maximumf %129, %130 : vector<16x1xf32>
    %132 = math.rsqrt %131 : vector<16x1xf32>
    %133 = vector.broadcast %132 : vector<16x1xf32> to vector<16x8xf32>
    %134 = arith.mulf %105, %133 : vector<16x8xf32>
    %135 = vector.broadcast %5 : vector<1x8xf32> to vector<16x8xf32>
    %136 = arith.mulf %135, %134 : vector<16x8xf32>
    %137 = vector.extract_strided_slice %136 {offsets = [0, 4], sizes = [16, 4], strides = [1, 1]} : vector<16x8xf32> to vector<16x4xf32>
    %138 = vector.extract_strided_slice %136 {offsets = [0, 0], sizes = [16, 4], strides = [1, 1]} : vector<16x8xf32> to vector<16x4xf32>
    %139 = tpu.concatenate %137, %138 in 1 : vector<16x4xf32>, vector<16x4xf32> -> vector<16x8xf32>
    %140 = arith.mulf %136, %8 : vector<16x8xf32>
    %141 = arith.mulf %139, %9 : vector<16x8xf32>
    %142 = arith.addf %140, %141 : vector<16x8xf32>
    %143 = arith.truncf %142 : vector<16x8xf32> to vector<16x8xbf16>
    %c0_49 = arith.constant 0 : index
    %c2_50 = arith.constant 2 : index
    %c0_51 = arith.constant 0 : index
    %c0_52 = arith.constant 0 : index
    %144 = vector.load %arg8[%c0_49, %c2_50, %c0_51, %c0_52] : memref<1x4x16x8xbf16, #tpu.memory_space<vmem>>, vector<1x1x16x8xbf16>
    %145 = vector.shape_cast %144 : vector<1x1x16x8xbf16> to vector<16x8xbf16>
    %146 = vector.shape_cast %143 : vector<16x8xbf16> to vector<1x1x16x8xbf16>
    tpu.vector_store %arg8[%c0_49, %c2_50, %c0_51, %c0_52], %146 {strides = array<i32>} : memref<1x4x16x8xbf16, #tpu.memory_space<vmem>>, vector<1x1x16x8xbf16>,
    %147 = arith.truncf %106 : vector<16x8xf32> to vector<16x8xbf16>
    %c0_53 = arith.constant 0 : index
    %c2_54 = arith.constant 2 : index
    %c0_55 = arith.constant 0 : index
    %c0_56 = arith.constant 0 : index
    %148 = vector.load %arg9[%c0_53, %c2_54, %c0_55, %c0_56] : memref<1x4x16x8xbf16, #tpu.memory_space<vmem>>, vector<1x1x16x8xbf16>
    %149 = vector.shape_cast %148 : vector<1x1x16x8xbf16> to vector<16x8xbf16>
    %150 = vector.shape_cast %147 : vector<16x8xbf16> to vector<1x1x16x8xbf16>
    tpu.vector_store %arg9[%c0_53, %c2_54, %c0_55, %c0_56], %150 {strides = array<i32>} : memref<1x4x16x8xbf16, #tpu.memory_space<vmem>>, vector<1x1x16x8xbf16>,
    %151 = vector.extract_strided_slice %4 {offsets = [0, 24], sizes = [16, 8], strides = [1, 1]} : vector<16x96xf32> to vector<16x8xf32>
    %152 = vector.extract_strided_slice %4 {offsets = [0, 56], sizes = [16, 8], strides = [1, 1]} : vector<16x96xf32> to vector<16x8xf32>
    %153 = vector.extract_strided_slice %4 {offsets = [0, 88], sizes = [16, 8], strides = [1, 1]} : vector<16x96xf32> to vector<16x8xf32>
    %154 = arith.mulf %151, %151 : vector<16x8xf32>
    %cst_57 = arith.constant dense<0.000000e+00> : vector<16xf32>
    %155 = vector.multi_reduction <add>, %154, %cst_57 [1] : vector<16x8xf32> to vector<16xf32>
    %156 = vector.shape_cast %155 : vector<16xf32> to vector<16x1xf32>
    %cst_58 = arith.constant 1.000000e-24 : f32
    %157 = vector.broadcast %cst_58 : f32 to vector<16x1xf32>
    %158 = arith.maximumf %156, %157 : vector<16x1xf32>
    %159 = math.rsqrt %158 : vector<16x1xf32>
    %160 = vector.broadcast %159 : vector<16x1xf32> to vector<16x8xf32>
    %161 = arith.mulf %151, %160 : vector<16x8xf32>
    %162 = vector.broadcast %7 : vector<1x8xf32> to vector<16x8xf32>
    %163 = arith.mulf %162, %161 : vector<16x8xf32>
    %164 = vector.extract_strided_slice %163 {offsets = [0, 4], sizes = [16, 4], strides = [1, 1]} : vector<16x8xf32> to vector<16x4xf32>
    %165 = vector.extract_strided_slice %163 {offsets = [0, 0], sizes = [16, 4], strides = [1, 1]} : vector<16x8xf32> to vector<16x4xf32>
    %166 = tpu.concatenate %164, %165 in 1 : vector<16x4xf32>, vector<16x4xf32> -> vector<16x8xf32>
    %167 = arith.mulf %163, %8 : vector<16x8xf32>
    %168 = arith.mulf %166, %9 : vector<16x8xf32>
    %169 = arith.addf %167, %168 : vector<16x8xf32>
    %170 = arith.truncf %169 : vector<16x8xf32> to vector<16x8xbf16>
    %c0_59 = arith.constant 0 : index
    %c3 = arith.constant 3 : index
    %c0_60 = arith.constant 0 : index
    %c0_61 = arith.constant 0 : index
    %171 = vector.load %arg7[%c0_59, %c3, %c0_60, %c0_61] : memref<1x4x16x8xbf16, #tpu.memory_space<vmem>>, vector<1x1x16x8xbf16>
    %172 = vector.shape_cast %171 : vector<1x1x16x8xbf16> to vector<16x8xbf16>
    %173 = vector.shape_cast %170 : vector<16x8xbf16> to vector<1x1x16x8xbf16>
    tpu.vector_store %arg7[%c0_59, %c3, %c0_60, %c0_61], %173 {strides = array<i32>} : memref<1x4x16x8xbf16, #tpu.memory_space<vmem>>, vector<1x1x16x8xbf16>,
    %174 = arith.mulf %152, %152 : vector<16x8xf32>
    %cst_62 = arith.constant dense<0.000000e+00> : vector<16xf32>
    %175 = vector.multi_reduction <add>, %174, %cst_62 [1] : vector<16x8xf32> to vector<16xf32>
    %176 = vector.shape_cast %175 : vector<16xf32> to vector<16x1xf32>
    %cst_63 = arith.constant 1.000000e-24 : f32
    %177 = vector.broadcast %cst_63 : f32 to vector<16x1xf32>
    %178 = arith.maximumf %176, %177 : vector<16x1xf32>
    %179 = math.rsqrt %178 : vector<16x1xf32>
    %180 = vector.broadcast %179 : vector<16x1xf32> to vector<16x8xf32>
    %181 = arith.mulf %152, %180 : vector<16x8xf32>
    %182 = vector.broadcast %5 : vector<1x8xf32> to vector<16x8xf32>
    %183 = arith.mulf %182, %181 : vector<16x8xf32>
    %184 = vector.extract_strided_slice %183 {offsets = [0, 4], sizes = [16, 4], strides = [1, 1]} : vector<16x8xf32> to vector<16x4xf32>
    %185 = vector.extract_strided_slice %183 {offsets = [0, 0], sizes = [16, 4], strides = [1, 1]} : vector<16x8xf32> to vector<16x4xf32>
    %186 = tpu.concatenate %184, %185 in 1 : vector<16x4xf32>, vector<16x4xf32> -> vector<16x8xf32>
    %187 = arith.mulf %183, %8 : vector<16x8xf32>
    %188 = arith.mulf %186, %9 : vector<16x8xf32>
    %189 = arith.addf %187, %188 : vector<16x8xf32>
    %190 = arith.truncf %189 : vector<16x8xf32> to vector<16x8xbf16>
    %c0_64 = arith.constant 0 : index
    %c3_65 = arith.constant 3 : index
    %c0_66 = arith.constant 0 : index
    %c0_67 = arith.constant 0 : index
    %191 = vector.load %arg8[%c0_64, %c3_65, %c0_66, %c0_67] : memref<1x4x16x8xbf16, #tpu.memory_space<vmem>>, vector<1x1x16x8xbf16>
    %192 = vector.shape_cast %191 : vector<1x1x16x8xbf16> to vector<16x8xbf16>
    %193 = vector.shape_cast %190 : vector<16x8xbf16> to vector<1x1x16x8xbf16>
    tpu.vector_store %arg8[%c0_64, %c3_65, %c0_66, %c0_67], %193 {strides = array<i32>} : memref<1x4x16x8xbf16, #tpu.memory_space<vmem>>, vector<1x1x16x8xbf16>,
    %194 = arith.truncf %153 : vector<16x8xf32> to vector<16x8xbf16>
    %c0_68 = arith.constant 0 : index
    %c3_69 = arith.constant 3 : index
    %c0_70 = arith.constant 0 : index
    %c0_71 = arith.constant 0 : index
    %195 = vector.load %arg9[%c0_68, %c3_69, %c0_70, %c0_71] : memref<1x4x16x8xbf16, #tpu.memory_space<vmem>>, vector<1x1x16x8xbf16>
    %196 = vector.shape_cast %195 : vector<1x1x16x8xbf16> to vector<16x8xbf16>
    %197 = vector.shape_cast %194 : vector<16x8xbf16> to vector<1x1x16x8xbf16>
    tpu.vector_store %arg9[%c0_68, %c3_69, %c0_70, %c0_71], %197 {strides = array<i32>} : memref<1x4x16x8xbf16, #tpu.memory_space<vmem>>, vector<1x1x16x8xbf16>,
    return
  }
  func.func @transform_0(%arg0: i32, %arg1: i32) -> (i32, i32, i32) {
    %c0_i32 = arith.constant 0 : i32
    %c0_i32_0 = arith.constant 0 : i32
    return %arg0, %arg1, %c0_i32 : i32, i32, i32
  }
  func.func @transform_1(%arg0: i32, %arg1: i32) -> (i32, i32) {
    %c0_i32 = arith.constant 0 : i32
    %c0_i32_0 = arith.constant 0 : i32
    return %arg1, %c0_i32 : i32, i32
  }
  func.func @transform_2(%arg0: i32, %arg1: i32) -> (i32, i32) {
    %c0_i32 = arith.constant 0 : i32
    %c0_i32_0 = arith.constant 0 : i32
    return %arg1, %c0_i32 : i32, i32
  }
  func.func @transform_3(%arg0: i32, %arg1: i32) -> (i32, i32) {
    %c0_i32 = arith.constant 0 : i32
    %c0_i32_0 = arith.constant 0 : i32
    %c0_i32_1 = arith.constant 0 : i32
    return %c0_i32, %c0_i32_0 : i32, i32
  }
  func.func @transform_4(%arg0: i32, %arg1: i32) -> (i32, i32) {
    %c0_i32 = arith.constant 0 : i32
    %c0_i32_0 = arith.constant 0 : i32
    %c0_i32_1 = arith.constant 0 : i32
    return %c0_i32, %c0_i32_0 : i32, i32
  }
  func.func @transform_5(%arg0: i32, %arg1: i32) -> (i32, i32, i32, i32) {
    %c0_i32 = arith.constant 0 : i32
    %c0_i32_0 = arith.constant 0 : i32
    %c0_i32_1 = arith.constant 0 : i32
    return %arg0, %c0_i32, %arg1, %c0_i32_0 : i32, i32, i32, i32
  }
  func.func @transform_6(%arg0: i32, %arg1: i32) -> (i32, i32, i32, i32) {
    %c0_i32 = arith.constant 0 : i32
    %c0_i32_0 = arith.constant 0 : i32
    %c0_i32_1 = arith.constant 0 : i32
    return %arg0, %c0_i32, %arg1, %c0_i32_0 : i32, i32, i32, i32
  }
  func.func @transform_7(%arg0: i32, %arg1: i32) -> (i32, i32, i32, i32) {
    %c0_i32 = arith.constant 0 : i32
    %c0_i32_0 = arith.constant 0 : i32
    %c0_i32_1 = arith.constant 0 : i32
    return %arg0, %c0_i32, %arg1, %c0_i32_0 : i32, i32, i32, i32
  }
}

</mosaic_0001>

<bundles_post_ra>
// kernel: tpu_custom_call.1
= control target key start
LH: loop header
LB: loop body
LE: loop exit
PB: predicated region body
PF: predicated region fallthrough
CT: control target
= control target key end

     0   :  { %s1677_s24 = smov 0   ;;  %s1679_s25 = smov 0   ;;  %s2160_s0 = inlined_call_operand.vmem [shape: f32[2,32,32], index: 0, kind: input, shape index: {}]   ;;  %s2161_s1 = inlined_call_operand.vmem [shape: f32[32,8], index: 1, kind: input, shape index: {}]   ;;  %s2162_s2 = inlined_call_operand.vmem [shape: f32[32,8], index: 2, kind: input, shape index: {}]   ;;  %s2163_s3 = inlined_call_operand.vmem [shape: bf16[32,96], index: 3, kind: input, shape index: {}]   ;;  %s2164_s4 = inlined_call_operand.vmem [shape: f32[1,8], index: 4, kind: input, shape index: {}]   ;;  %s2165_s5 = inlined_call_operand.vmem [shape: bf16[2,4,32,8], index: 5, kind: output, shape index: {0}]   ;;  %s2166_s6 = inlined_call_operand.vmem [shape: bf16[2,4,32,8], index: 6, kind: output, shape index: {1}]   ;;  %s2167_s7 = inlined_call_operand.vmem [shape: bf16[2,4,32,8], index: 7, kind: output, shape index: {2}]  }
   0x1   :  { %s1681_s26 = smov 0   ;;  %s1683_s27 = smov 0  }
   0x2   :  { %s1685_s28 = smov 0   ;;  %s1687_s29 = smov 0  }
   0x3   :  { %s1689_s30 = smov 0  }
   0x4 LB: > { %s27_s8 = sadd.s32 1, %s1612_s28  ;;  %s30_s9 = sadd.s32 1, %s1616_s29  ;;  %s1620_s30 = sphi %s1689_s30, %s18_s30   ;;  %s1616_s29 = sphi %s1687_s29, %s2184_s29   ;;  %s1612_s28 = sphi %s1685_s28, %s2183_s28   ;;  %s1608_s27 = sphi %s1683_s27, %s2182_s27   ;;  %s1604_s26 = sphi %s1681_s26, %s2181_s26   ;;  %s1600_s25 = sphi %s1679_s25, %s2180_s25   ;;  %s1596_s24 = sphi %s1677_s24, %s2179_s24  }
   0x5   : > { %p28_p0 = scmp.ge.s32.totalorder %s27_s8, 2  ;;  %s1364_s10 = sadd.s32 4294967295, %s1620_s30  }
   0x6   : > { %p171_p1 = scmp.ne.s32.totalorder %s1600_s25, %s1596_s24  ;;  %p172_p2 = scmp.eq.s32.totalorder %s1364_s10, 3 }
   0x7   : > { %s2186_s8 = smov (%p28_p0, %s27_s8), 0  ;;  %s2188_s9 = smov (!%p28_p0, %s30_s9), %s1616_s29 }
   0x8   : > { %s157_s11 = ssub.s32 %s1612_s28, %s2186_s8  ;;  %p32_p3 = scmp.ge.s32.totalorder %s2188_s9, 2 }
   0x9   : > { %p1368_p4 = scmp.ge.s32.totalorder %s1620_s30, 1  ;;  %p1723_p5 = por %p172_p2, %p171_p1 }
   0xa   : > { %p289_p6 = scmp.lt.s32.totalorder %s1620_s30, 5  ;;  %s2190_s9 = smov (%p32_p3, %s2188_s9), 0 }
   0xb   : > { %s156_s13 = ssub.s32 %s1616_s29, %s2190_s9  ;;  %s161_s15 = sadd.s32 1, %s1600_s25 }
   0xc   : > { %p290_p7 = pnand %p1368_p4, %p289_p6  ;;  %s158_s14 = sor.u32 %s157_s11, %s156_s13 }
   0xd   : > { %p159_p8 = scmp.eq.s32.totalorder %s158_s14, 0  ;;  %v1532_v0 = vld [vmem:[%s2163_s3] sm:$0xff] (!%p290_p7)   ;;  %v1622_v1 = vmov (!%p290_p7), 0.0   ;;  %v1533_v2 = vld [vmem:[%s2163_s3 + $0x8] sm:$0xff] (!%p290_p7)   ;;  %vm1623_vm0 = vmmov (!%p290_p7), 0   ;;  %s1743_s21 = sshll.u32 (!%p290_p7), %s1604_s26, 1  ;;  %v454_v46 = vlaneseq (!%p290_p7) }
   0xe   : > { %293 = sbr.rel (%p290_p7) target bundleno = 861 (0x35d), region = 40  ;;  %1453 = vmatprep.subr.bf16.mxu0 (!%p290_p7), %v1622_v1  ;;  %1457 = vmatprep.mubr.msk.bf16.mxu0 (!%p290_p7), %vm1623_vm0, %v1622_v1  ;;  %p343_p9 = scmp.lt.s32.totalorder (!%p290_p7), %s1608_s27, 1  ;;  %vm387_vm1 = vcmask (!%p290_p7), 261120   ;;  %vm440_vm2 = vcmask (!%p290_p7), 64512   ;;  %vm492_vm3 = vcmask (!%p290_p7), 60416   ;;  %vm475_vm4 = vcmask (!%p290_p7), 31744  }
   0xf   : > { %s1734_s16 = scalar_select %p159_p8, %s1600_s25, %s161_s15  }
  0x10   : > { %1454 = vmatpush3.bf16.msra.mxu0 (!%p290_p7), %v1532_v0  ;;  %p345_p10 = scmp.lt.s32.totalorder (!%p290_p7), %s1743_s21, 3  ;;  %s1624_s26 = smov (!%p290_p7), 96   ;;  %v1813_v49 = vshrl.u32 (!%p290_p7), %v454_v46, 7  ;;  %v1818_v50 = vld [vmem:[%s2164_s4] sm:$0x1] (!%p290_p7) }
  0x11   : > { %1455 = vmatprep.subr.bf16.mxu0 (!%p290_p7), %v1622_v1  ;;  %s1625_s18 = smov (!%p290_p7), 64   ;;  %s2173_s19 = smov (!%p290_p7), 120   ;;  %v433_v51 = vmul.f32 (!%p290_p7), 2.828427, %v1818_v50 }
  0x12   : > { %s1627_s20 = smov (!%p290_p7), 88   ;;  %s327_s14 = sand.u32 (!%p290_p7), 1, %s1596_s24   ;;  %v456_v52 = vsub.s32 (!%p290_p7), 0, %v1813_v49 }
  0x13   : > { %s1790_s15 = sshll.u32 (!%p290_p7), %s327_s14, 5  ;;  %s1632_s14 = smov (!%p290_p7), 56  }
  0x14   : > { %1456 = vmatpush3.bf16.msra.mxu0 (!%p290_p7), %v1533_v2  ;;  %v1825_v55 = vrot.slane (!%p290_p7), %v433_v51, %v456_v52  ;;  %s2168_s24 = smov (!%p290_p7), 4  }
  0x15   : > { %s344_s22 = scalar_select %p343_p9, %s1608_s27, 1 }
  0x16   : > { %s1749_s23 = scalar_select %p345_p10, %s1743_s21, 3 }
  0x17   : > { %s1373_s10 = sshll.u32 %s344_s22, 2  ;;  %s1628_s22 = smov 112  }
  0x18   : > { %s348_s11 = sadd.s32 %s1373_s10, %s1749_s23  ;;  %s1629_s10 = smov 80  }
  0x19   : > { %s1374_s13 = sshll.u32 %s348_s11, 3  ;;  %s2172_s11 = smov 104  }
  0x1a   : > { %s350_s17 = scalar_lea.vmem %s2160_s0, %s1374_s13  ;;  %s1631_s13 = smov 72  }
  0x1b   : > { %v368_v3 = vld [vmem:[%s350_s17] sm:$0xff]  ;;  %v369_v4 = vld [vmem:[%s350_s17 + $0x8] sm:$0xff]  ;;  %s1794_s17 = scalar_lea.vmem [#allocation4], %s1790_s15 }
  0x1c   : > { %v370_v5 = vpack.c.bf16 %v369_v4, %v368_v3 }
  0x1e   : > { %1458 = vmatmul.mubr.msk.bf16.vlgmr.msra.gmra.mrb[0].mxu0 %vm387_vm1, %v370_v5 }
  0xf1   : > { %v1755_v6 = vpop.f32.mrb[0].mxu0 }
  0xf2   : > { %v438_v7 = vmul.f32 %v1755_v6, %v1755_v6  ;;  %v1459_v8 = vpop.f32.mrb[1].mxu0  ;;  %v1765_v12 = vpack.c.bf16 %v1755_v6, %v1755_v6 }
  0xf3   : > { %v1759_v9 = vpop.f32.mrb[2].mxu0 }
  0xf4   : > { %497 = vrot.lane.b32.xlu1 %v438_v7, %s1624_s26  ;;  %v1460_v10 = vpop.f32.mrb[3].mxu0  ;;  %v441_v11 = vsel %vm440_vm2, %v438_v7, 0.0  ;;  %v1774_v13 = vpack.c.bf16 %v1759_v9, %v1759_v9  ;;  %v439_v14 = vmul.f32 %v1759_v9, %v1759_v9 }
  0xf5   : > { %442 = vadd.xlane.f32.xlu0 %v441_v11 }
  0xf6   : > { %v444_v15 = vsel %vm440_vm2, %v439_v14, 0.0 }
  0xf8   : > { %569 = vrot.lane.b32.xlu1 %v1765_v12, %s1625_s18 }
  0xfc   : > { %577 = vrot.lane.b32.xlu1 %v438_v7, %s2173_s19 }
 0x100   : > { %638 = vrot.lane.b32.xlu1 %v438_v7, %s1627_s20 }
 0x104   : > { %708 = vrot.lane.b32.xlu1 %v438_v7, %s1628_s22 }
 0x108   : > { %769 = vrot.lane.b32.xlu1 %v438_v7, %s1629_s10 }
 0x10b   : > { %571 = vrot.lane.b32.xlu0 %v1774_v13, %s1625_s18  ;;  %s2170_s18 = smov 124  }
 0x10c   : > { %839 = vrot.lane.b32.xlu1 %v438_v7, %s2172_s11 }
 0x10f   : > { %579 = vrot.lane.b32.xlu0 %v439_v14, %s2173_s19 }
 0x110   : > { %499 = vrot.lane.b32.xlu1 %v439_v14, %s1624_s26 }
 0x113   : > { %640 = vrot.lane.b32.xlu0 %v439_v14, %s1627_s20 }
 0x114   : > { %900 = vrot.lane.b32.xlu1 %v438_v7, %s1631_s13 }
 0x117   : > { %710 = vrot.lane.b32.xlu0 %v439_v14, %s1628_s22 }
 0x11b   : > { %771 = vrot.lane.b32.xlu0 %v439_v14, %s1629_s10 }
 0x11f   : > { %841 = vrot.lane.b32.xlu0 %v439_v14, %s2172_s11 }
 0x123   : > { %902 = vrot.lane.b32.xlu0 %v439_v14, %s1631_s13 }
 0x142   : > { %445 = vadd.xlane.f32.xlu0 %v444_v15 }
 0x166   : > { %v498_v16 = vpop.permute.xlu1 %497 }
 0x167   : > { %v503_v17 = vsel %vm440_vm2, %v498_v16, 0.0 }
 0x168   : > { %504 = vadd.xlane.f32.xlu1 %v503_v17 }
 0x16a   : > { %v570_v18 = vpop.permute.xlu1 %569 }
 0x16b   : > { %575 = vst.msk [vmem:[%s1794_s17] sm:$0xf] %vm492_vm3, %v570_v18 }
 0x16e   : > { %v578_v19 = vpop.permute.xlu1 %577 }
 0x16f   : > { %v583_v20 = vsel %vm440_vm2, %v578_v19, 0.0 }
 0x170   : > { %584 = vadd.xlane.f32.xlu1 %v583_v20 }
 0x172   : > { %v639_v21 = vpop.permute.xlu1 %638 }
 0x173   : > { %v644_v22 = vsel %vm440_vm2, %v639_v21, 0.0 }
 0x174   : > { %645 = vadd.xlane.f32.xlu1 %v644_v22 }
 0x176   : > { %v709_v23 = vpop.permute.xlu1 %708 }
 0x177   : > { %v714_v24 = vsel %vm440_vm2, %v709_v23, 0.0 }
 0x178   : > { %715 = vadd.xlane.f32.xlu0 %v714_v24 }
 0x17a   : > { %v770_v25 = vpop.permute.xlu1 %769 }
 0x17b   : > { %v775_v26 = vsel %vm440_vm2, %v770_v25, 0.0 }
 0x17c   : > { %776 = vadd.xlane.f32.xlu0 %v775_v26 }
 0x17e   : > { %v840_v27 = vpop.permute.xlu1 %839 }
 0x17f   : > { %v845_v28 = vsel %vm440_vm2, %v840_v27, 0.0 }
 0x180   : > { %846 = vadd.xlane.f32.xlu0 %v845_v28 }
 0x182   : > { %v443_v29 = vpop.xlane.xlu0 %442  ;;  %v500_v30 = vpop.permute.xlu1 %499 }
 0x183   : > { %v506_v31 = vsel %vm440_vm2, %v500_v30, 0.0  ;;  %v447_v42 = vmax.f32 %v443_v29, 1e-24 }
 0x184   : > { %507 = vadd.xlane.f32.xlu0 %v506_v31 }
 0x185   : > { %1534 = vrsqrt.f32 %v447_v42 }
 0x186   : > { %v572_v32 = vpop.permute.xlu0 %571  ;;  %v901_v37 = vpop.permute.xlu1 %900 }
 0x187   : > { %576 = vst.msk [vmem:[%s1794_s17 + $0x4] sm:$0xf] %vm492_vm3, %v572_v32  ;;  %v906_v40 = vsel %vm440_vm2, %v901_v37, 0.0 }
 0x18a   : > { %v580_v33 = vpop.permute.xlu0 %579 }
 0x18b   : > { %v586_v34 = vsel %vm440_vm2, %v580_v33, 0.0 }
 0x18c   : > { %587 = vadd.xlane.f32.xlu0 %v586_v34 }
 0x18e   : > { %v641_v35 = vpop.permute.xlu0 %640 }
 0x18f   : > { %v647_v36 = vsel %vm440_vm2, %v641_v35, 0.0  ;;  %v1535_v53 = vpop.eup %1534 }
 0x190   : > { %648 = vadd.xlane.f32.xlu0 %v647_v36  ;;  %v451_v54 = vmul.f32 %v1535_v53, %v1755_v6 }
 0x192   : > { %v711_v38 = vpop.permute.xlu0 %710  ;;  %v1829_v56 = vmul.f32 %v1825_v55, %v451_v54 }
 0x193   : > { %v717_v39 = vsel %vm440_vm2, %v711_v38, 0.0 }
 0x194   : > { %718 = vadd.xlane.f32.xlu1 %v717_v39  ;;  %907 = vadd.xlane.f32.xlu0 %v906_v40 }
 0x196   : > { %v772_v41 = vpop.permute.xlu0 %771 }
 0x197   : > { %v778_v43 = vsel %vm440_vm2, %v772_v41, 0.0 }
 0x198   : > { %779 = vadd.xlane.f32.xlu1 %v778_v43 }
 0x19a   : > { %v842_v44 = vpop.permute.xlu0 %841 }
 0x19b   : > { %v848_v45 = vsel %vm440_vm2, %v842_v44, 0.0 }
 0x19c   : > { %849 = vadd.xlane.f32.xlu1 %v848_v45 }
 0x19e   : > { %v903_v47 = vpop.permute.xlu0 %902 }
 0x19f   : > { %v909_v48 = vsel %vm440_vm2, %v903_v47, 0.0 }
 0x1a0   : > { %910 = vadd.xlane.f32.xlu1 %v909_v48 }
 0x1aa   : > { %701 = vrot.lane.b32.xlu0 %v1774_v13, %s1632_s14 }
 0x1ae   : > { %469 = vrot.lane.b32.xlu0 %v1829_v56, %s2168_s24 }
 0x1b1   : > { %699 = vrot.lane.b32.xlu1 %v1765_v12, %s1632_s14 }
 0x1b5   : > { %463 = vrot.lane.b32.xlu1 %v1829_v56, %s2170_s18 }
 0x1cf   : > { %v446_v57 = vpop.xlane.xlu0 %445 }
 0x1d0   : > { %v448_v58 = vmax.f32 %v446_v57, 1e-24 }
 0x1d2   : > { %1536 = vrsqrt.f32 %v448_v58 }
 0x1dc   : > { %v1537_v59 = vpop.eup %1536 }
 0x1dd   : > { %v452_v60 = vmul.f32 %v1537_v59, %v1759_v9 }
 0x1df   : > { %v1838_v61 = vmul.f32 %v1825_v55, %v452_v60 }
 0x1e1   : > { %465 = vrot.lane.b32.xlu1 %v1838_v61, %s2170_s18 }
 0x1e5   : > { %471 = vrot.lane.b32.xlu1 %v1838_v61, %s2168_s24  ;;  %s1636_s24 = smov 40  }
 0x1f5   : > { %v505_v62 = vpop.xlane.xlu1 %504 }
 0x1f6   : > { %v509_v63 = vmax.f32 %v505_v62, 1e-24 }
 0x1f8   : > { %1538 = vrsqrt.f32 %v509_v63 }
 0x1fd   : > { %v585_v0 = vpop.xlane.xlu1 %584 }
 0x1fe   : > { %v589_v1 = vmax.f32 %v585_v0, 1e-24 }
 0x200   : > { %1540 = vrsqrt.f32 %v589_v1 }
 0x201   : > { %v646_v2 = vpop.xlane.xlu1 %645 }
 0x202   : > { %v1539_v3 = vpop.eup %1538  ;;  %v650_v4 = vmax.f32 %v646_v2, 1e-24 }
 0x203   : > { %v513_v5 = vmul.f32 %v1539_v3, %v1755_v6 }
 0x204   : > { %1542 = vrsqrt.f32 %v650_v4 }
 0x205   : > { %523 = vrot.lane.b32.xlu1 %v513_v5, %s1624_s26  ;;  %v716_v7 = vpop.xlane.xlu0 %715 }
 0x206   : > { %v720_v8 = vmax.f32 %v716_v7, 1e-24 }
 0x208   : > { %1544 = vrsqrt.f32 %v720_v8 }
 0x209   : > { %v777_v10 = vpop.xlane.xlu0 %776 }
 0x20a   : > { %v1541_v11 = vpop.eup %1540  ;;  %v781_v14 = vmax.f32 %v777_v10, 1e-24 }
 0x20b   : > { %v593_v15 = vmul.f32 %v1541_v11, %v1755_v6 }
 0x20c   : > { %1546 = vrsqrt.f32 %v781_v14 }
 0x20d   : > { %597 = vrot.lane.b32.xlu0 %v593_v15, %s2173_s19  ;;  %v847_v16 = vpop.xlane.xlu0 %846  ;;  %s2176_s19 = smov 104  }
 0x20e   : > { %v1543_v17 = vpop.eup %1542  ;;  %v851_v18 = vmax.f32 %v847_v16, 1e-24 }
 0x20f   : > { %v654_v19 = vmul.f32 %v1543_v17, %v1755_v6 }
 0x210   : > { %1548 = vrsqrt.f32 %v851_v18 }
 0x211   : > { %658 = vrot.lane.b32.xlu1 %v654_v19, %s1627_s20  ;;  %v508_v20 = vpop.xlane.xlu0 %507 }
 0x212   : > { %v1545_v21 = vpop.eup %1544  ;;  %v510_v22 = vmax.f32 %v508_v20, 1e-24 }
 0x213   : > { %v724_v23 = vmul.f32 %v1545_v21, %v1755_v6  ;;  %v519_v21 = vrot.slane %v1818_v50, %v456_v52 }
 0x214   : > { %1550 = vrsqrt.f32 %v510_v22 }
 0x215   : > { %728 = vrot.lane.b32.xlu1 %v724_v23, %s1628_s22 }
 0x216   : > { %v1547_v24 = vpop.eup %1546 }
 0x217   : > { %v785_v25 = vmul.f32 %v1547_v24, %v1755_v6 }
 0x219   : > { %789 = vrot.lane.b32.xlu1 %v785_v25, %s1629_s10  ;;  %v588_v26 = vpop.xlane.xlu0 %587 }
 0x21a   : > { %v1549_v27 = vpop.eup %1548  ;;  %v590_v37 = vmax.f32 %v588_v26, 1e-24 }
 0x21b   : > { %v855_v28 = vmul.f32 %v1549_v27, %v1755_v6 }
 0x21d   : > { %859 = vrot.lane.b32.xlu1 %v855_v28, %s2172_s11  ;;  %v649_v29 = vpop.xlane.xlu0 %648  ;;  %s2177_s11 = smov 124  }
 0x21e   : > { %v1551_v30 = vpop.eup %1550  ;;  %v651_v31 = vmax.f32 %v649_v29, 1e-24 }
 0x21f   : > { %v514_v32 = vmul.f32 %v1551_v30, %v1759_v9 }
 0x220   : > { %1552 = vrsqrt.f32 %v651_v31 }
 0x221   : > { %v719_v33 = vpop.xlane.xlu1 %718  ;;  %525 = vrot.lane.b32.xlu0 %v514_v32, %s1624_s26  ;;  %v908_v34 = vpop.xlane.xlu0 %907  ;;  %s1376_s26 = sshll.u32 %s1749_s23, 3  ;;  %s2175_s23 = smov 120  }
 0x222   : > { %v721_v35 = vmax.f32 %v719_v33, 1e-24  ;;  %v912_v36 = vmax.f32 %v908_v34, 1e-24  ;;  %s1868_s18 = scalar_lea.vmem %s2161_s1, %s1376_s26 }
 0x223   : > { %v1881_v59 = vld [vmem:[%s1868_s18] sm:$0xff]  ;;  %v1905_v14 = vld [vmem:[%s1868_s18 + $0x8] sm:$0xff]  ;;  %s2024_s18 = scalar_lea.vmem [#allocation3], %s1790_s15 }
 0x224   : > { %1554 = vrsqrt.f32 %v721_v35  ;;  %v478_v3 = vmul.f32 %v1829_v56, %v1881_v59 }
 0x225   : > { %1556 = vrsqrt.f32 %v912_v36  ;;  %v780_v38 = vpop.xlane.xlu1 %779  ;;  %v702_v39 = vpop.permute.xlu0 %701 }
 0x226   : > { %v782_v40 = vmax.f32 %v780_v38, 1e-24  ;;  %1397 = vst.msk [vmem:[%s1794_s17 + $0xc] sm:$0xf] %vm492_vm3, %v702_v39  ;;  %1558 = vrsqrt.f32 %v590_v37 }
 0x228   : > { %1560 = vrsqrt.f32 %v782_v40 }
 0x229   : > { %v850_v41 = vpop.xlane.xlu1 %849  ;;  %v470_v63 = vpop.permute.xlu0 %469 }
 0x22a   : > { %v1553_v42 = vpop.eup %1552  ;;  %v852_v43 = vmax.f32 %v850_v41, 1e-24 }
 0x22b   : > { %v655_v44 = vmul.f32 %v1553_v42, %v1759_v9 }
 0x22c   : > { %1562 = vrsqrt.f32 %v852_v43 }
 0x22d   : > { %v911_v45 = vpop.xlane.xlu1 %910  ;;  %660 = vrot.lane.b32.xlu0 %v655_v44, %s1627_s20  ;;  %s1873_s20 = scalar_lea.vmem %s2162_s2, %s1376_s26 }
 0x22e   : > { %v1555_v46 = vpop.eup %1554  ;;  %v913_v47 = vmax.f32 %v911_v45, 1e-24  ;;  %v1884_v60 = vld [vmem:[%s1873_s20] sm:$0xff]  ;;  %v1908_v15 = vld [vmem:[%s1873_s20 + $0x8] sm:$0xff] }
 0x22f   : > { %v1557_v48 = vpop.eup %1556  ;;  %v725_v51 = vmul.f32 %v1555_v46, %v1759_v9 }
 0x230   : > { %1564 = vrsqrt.f32 %v913_v47  ;;  %v916_v53 = vmul.f32 %v1557_v48, %v1755_v6  ;;  %v1559_v54 = vpop.eup %1558 }
 0x231   : > { %v700_v57 = vpop.permute.xlu1 %699  ;;  %730 = vrot.lane.b32.xlu0 %v725_v51, %s1628_s22  ;;  %v594_v62 = vmul.f32 %v1559_v54, %v1759_v9  ;;  %s1635_s22 = smov 48  }
 0x232   : > { %v1561_v58 = vpop.eup %1560  ;;  %1396 = vst.msk [vmem:[%s1794_s17 + $0x8] sm:$0xf] %vm492_vm3, %v700_v57  ;;  %920 = vrot.lane.b32.xlu1 %v916_v53, %s1631_s13 }
 0x233   : > { %v786_v6 = vmul.f32 %v1561_v58, %v1759_v9 }
 0x235   : > { %v464_v0 = vpop.permute.xlu1 %463  ;;  %791 = vrot.lane.b32.xlu0 %v786_v6, %s1629_s10  ;;  %s1898_s10 = scalar_lea.vmem [#allocation2], %s1790_s15  ;;  %s1422_s15 = sshll.u32 (%p1723_p5), %s1608_s27, 4 }
 0x236   : > { %v1563_v1 = vpop.eup %1562  ;;  %v476_v2 = vsel %vm475_vm4, %v464_v0, %v470_v63  ;;  %599 = vrot.lane.b32.xlu1 %v594_v62, %s2175_s23  ;;  %s987_s26 = sadd.s32 (%p1723_p5), %s1422_s15, %s1743_s21 }
 0x237   : > { %v480_v4 = vmul.f32 %v476_v2, %v1884_v60  ;;  %v856_v5 = vmul.f32 %v1563_v1, %v1759_v9  ;;  %s1423_s14 = sshll.u32 (%p1723_p5), %s987_s26, 2 }
 0x239   : > { %v482_v7 = vadd.f32 %v480_v4, %v478_v3  ;;  %861 = vrot.lane.b32.xlu0 %v856_v5, %s2176_s19  ;;  %s989_s19 = scalar_lea.vmem (%p1723_p5), %s2165_s5, %s1423_s14 }
 0x23a   : > { %v1565_v8 = vpop.eup %1564  ;;  %830 = vrot.lane.b32.xlu1 %v1765_v12, %s1635_s22 }
 0x23b   : > { %v1432_v10 = vpack.c.bf16 %v482_v7, %v482_v7  ;;  %v917_v11 = vmul.f32 %v1565_v8, %v1759_v9  ;;  %v479_v9 = vmul.f32 %v1838_v61, %v1905_v14 }
 0x23d   : > { %493 = vst.msk [vmem:[%s1898_s10] sm:$0xf] %vm492_vm3, %v1432_v10  ;;  %922 = vrot.lane.b32.xlu0 %v917_v11, %s1631_s13  ;;  %s2178_s13 = smov 4  }
 0x241   : > { %832 = vrot.lane.b32.xlu0 %v1774_v13, %s1635_s22 }
 0x253   : > { %v466_v56 = vpop.permute.xlu1 %465 }
 0x257   : > { %v472_v16 = vpop.permute.xlu1 %471 }
 0x258   : > { %v477_v17 = vsel %vm475_vm4, %v466_v56, %v472_v16 }
 0x259   : > { %v481_v18 = vmul.f32 %v477_v17, %v1908_v15 }
 0x25b   : > { %v483_v19 = vadd.f32 %v481_v18, %v479_v9 }
 0x25d   : > { %v1433_v20 = vpack.c.bf16 %v483_v19, %v483_v19 }
 0x25f   : > { %494 = vst.msk [vmem:[%s1898_s10 + $0x4] sm:$0xf] %vm492_vm3, %v1433_v20 }
 0x277   : > { %v524_v22 = vpop.permute.xlu1 %523 }
 0x278   : > { %v1919_v23 = vmul.f32 %v524_v22, %v519_v21 }
 0x27a   : > { %533 = vrot.lane.b32.xlu1 %v1919_v23, %s2177_s11  ;;  %v547_v51 = vmul.f32 %v1919_v23, %v1881_v59 }
 0x27e   : > { %539 = vrot.lane.b32.xlu1 %v1919_v23, %s2178_s13 }
 0x27f   : > { %v598_v61 = vpop.permute.xlu0 %597 }
 0x280   : > { %v1926_v24 = vmul.f32 %v598_v61, %v1825_v55 }
 0x282   : > { %613 = vrot.lane.b32.xlu0 %v1926_v24, %s2178_s13  ;;  %607 = vrot.lane.b32.xlu1 %v1926_v24, %s2177_s11  ;;  %v621_v62 = vmul.f32 %v1926_v24, %v1881_v59 }
 0x283   : > { %v659_v49 = vpop.permute.xlu1 %658 }
 0x284   : > { %v1932_v50 = vmul.f32 %v659_v49, %v519_v21 }
 0x286   : > { %668 = vrot.lane.b32.xlu1 %v1932_v50, %s2177_s11  ;;  %v682_v5 = vmul.f32 %v1932_v50, %v1881_v59 }
 0x287   : > { %v729_v52 = vpop.permute.xlu1 %728 }
 0x288   : > { %v1939_v25 = vmul.f32 %v729_v52, %v1825_v55 }
 0x28a   : > { %674 = vrot.lane.b32.xlu1 %v1932_v50, %s2178_s13  ;;  %v752_v17 = vmul.f32 %v1939_v25, %v1881_v59 }
 0x28b   : > { %v790_v26 = vpop.permute.xlu1 %789 }
 0x28c   : > { %v1945_v28 = vmul.f32 %v790_v26, %v519_v21 }
 0x28e   : > { %738 = vrot.lane.b32.xlu1 %v1939_v25, %s2177_s11  ;;  %v813_v23 = vmul.f32 %v1945_v28, %v1881_v59 }
 0x28f   : > { %v860_v30 = vpop.permute.xlu1 %859 }
 0x290   : > { %v1956_v31 = vmul.f32 %v860_v30, %v1825_v55 }
 0x292   : > { %744 = vrot.lane.b32.xlu1 %v1939_v25, %s2178_s13  ;;  %v883_v26 = vmul.f32 %v1956_v31, %v1881_v59 }
 0x293   : > { %v526_v27 = vpop.permute.xlu0 %525 }
 0x294   : > { %v1947_v29 = vmul.f32 %v526_v27, %v519_v21 }
 0x296   : > { %799 = vrot.lane.b32.xlu1 %v1945_v28, %s2177_s11  ;;  %541 = vrot.lane.b32.xlu0 %v1947_v29, %s2178_s13 }
 0x29a   : > { %805 = vrot.lane.b32.xlu1 %v1945_v28, %s2178_s13 }
 0x29e   : > { %869 = vrot.lane.b32.xlu1 %v1956_v31, %s2177_s11 }
 0x29f   : > { %v661_v32 = vpop.permute.xlu0 %660 }
 0x2a0   : > { %v1973_v41 = vmul.f32 %v661_v32, %v519_v21 }
 0x2a2   : > { %875 = vrot.lane.b32.xlu1 %v1956_v31, %s2178_s13 }
 0x2a3   : > { %v731_v33 = vpop.permute.xlu0 %730 }
 0x2a4   : > { %v921_v34 = vpop.permute.xlu1 %920  ;;  %v1988_v44 = vmul.f32 %v731_v33, %v1825_v55 }
 0x2a5   : > { %v1962_v35 = vmul.f32 %v921_v34, %v519_v21 }
 0x2a7   : > { %930 = vrot.lane.b32.xlu1 %v1962_v35, %s2177_s11  ;;  %v792_v36 = vpop.permute.xlu0 %791 }
 0x2a8   : > { %v600_v37 = vpop.permute.xlu1 %599  ;;  %v1995_v45 = vmul.f32 %v792_v36, %v519_v21 }
 0x2a9   : > { %v1967_v38 = vmul.f32 %v600_v37, %v1825_v55 }
 0x2ab   : > { %609 = vrot.lane.b32.xlu0 %v1967_v38, %s2177_s11  ;;  %535 = vrot.lane.b32.xlu1 %v1947_v29, %s2177_s11  ;;  %v862_v39 = vpop.permute.xlu0 %861 }
 0x2ac   : > { %v831_v40 = vpop.permute.xlu1 %830  ;;  %v2002_v46 = vmul.f32 %v862_v39, %v1825_v55  ;;  %v548_v39 = vmul.f32 %v1947_v29, %v1905_v14 }
 0x2ad   : > { %1406 = vst.msk [vmem:[%s1794_s17 + $0x10] sm:$0xf] %vm492_vm3, %v831_v40 }
 0x2af   : > { %615 = vrot.lane.b32.xlu1 %v1967_v38, %s2178_s13  ;;  %670 = vrot.lane.b32.xlu0 %v1973_v41, %s2177_s11  ;;  %v923_v42 = vpop.permute.xlu0 %922 }
 0x2b3   : > { %936 = vrot.lane.b32.xlu1 %v1962_v35, %s2178_s13  ;;  %676 = vrot.lane.b32.xlu0 %v1973_v41, %s2178_s13  ;;  %v833_v43 = vpop.permute.xlu0 %832 }
 0x2b4   : > { %1407 = vst.msk [vmem:[%s1794_s17 + $0x14] sm:$0xf] %vm492_vm3, %v833_v43 }
 0x2b7   : > { %961 = vrot.lane.b32.xlu1 %v1765_v12, %s1636_s24  ;;  %740 = vrot.lane.b32.xlu0 %v1988_v44, %s2177_s11  ;;  %v2008_v12 = vmul.f32 %v923_v42, %v519_v21 }
 0x2bb   : > { %746 = vrot.lane.b32.xlu0 %v1988_v44, %s2178_s13 }
 0x2bf   : > { %801 = vrot.lane.b32.xlu0 %v1995_v45, %s2177_s11 }
 0x2c3   : > { %807 = vrot.lane.b32.xlu0 %v1995_v45, %s2178_s13 }
 0x2c7   : > { %871 = vrot.lane.b32.xlu0 %v2002_v46, %s2177_s11 }
 0x2cb   : > { %877 = vrot.lane.b32.xlu0 %v2002_v46, %s2178_s13 }
 0x2cf   : > { %932 = vrot.lane.b32.xlu0 %v2008_v12, %s2177_s11 }
 0x2d3   : > { %938 = vrot.lane.b32.xlu0 %v2008_v12, %s2178_s13 }
 0x2d7   : > { %963 = vrot.lane.b32.xlu0 %v1774_v13, %s1636_s24 }
 0x2ec   : > { %v534_v47 = vpop.permute.xlu1 %533 }
 0x2f0   : > { %v540_v55 = vpop.permute.xlu1 %539 }
 0x2f1   : > { %v545_v48 = vsel %vm475_vm4, %v534_v47, %v540_v55  ;;  %v622_v55 = vmul.f32 %v1967_v38, %v1905_v14  ;;  %v944_v38 = vmul.f32 %v1962_v35, %v1881_v59  ;;  %v753_v35 = vmul.f32 %v1988_v44, %v1905_v14 }
 0x2f2   : > { %v549_v53 = vmul.f32 %v545_v48, %v1884_v60 }
 0x2f4   : > { %v551_v54 = vadd.f32 %v549_v53, %v547_v51  ;;  %v608_v57 = vpop.permute.xlu1 %607  ;;  %v614_v58 = vpop.permute.xlu0 %613 }
 0x2f5   : > { %v619_v6 = vsel %vm475_vm4, %v608_v57, %v614_v58  ;;  %v683_v57 = vmul.f32 %v1973_v41, %v1905_v14 }
 0x2f6   : > { %v1434_v63 = vpack.c.bf16 %v551_v54, %v551_v54  ;;  %v623_v13 = vmul.f32 %v619_v6, %v1884_v60 }
 0x2f8   : > { %561 = vst.msk [vmem:[%s2024_s18] sm:$0xf] %vm492_vm3, %v1434_v63  ;;  %v625_v0 = vadd.f32 %v623_v13, %v621_v62  ;;  %v669_v1 = vpop.permute.xlu1 %668 }
 0x2fa   : > { %v1438_v2 = vpack.c.bf16 %v625_v0, %v625_v0 }
 0x2fc   : > { %1390 = vst.msk [vmem:[%s1898_s10 + $0x8] sm:$0xf] %vm492_vm3, %v1438_v2  ;;  %v675_v3 = vpop.permute.xlu1 %674 }
 0x2fd   : > { %v680_v4 = vsel %vm475_vm4, %v669_v1, %v675_v3 }
 0x2fe   : > { %v684_v7 = vmul.f32 %v680_v4, %v1884_v60 }
 0x300   : > { %v686_v8 = vadd.f32 %v684_v7, %v682_v5  ;;  %v739_v10 = vpop.permute.xlu1 %738 }
 0x302   : > { %v1440_v11 = vpack.c.bf16 %v686_v8, %v686_v8 }
 0x304   : > { %1394 = vst.msk [vmem:[%s2024_s18 + $0x8] sm:$0xf] %vm492_vm3, %v1440_v11  ;;  %v745_v56 = vpop.permute.xlu1 %744 }
 0x305   : > { %v750_v16 = vsel %vm475_vm4, %v739_v10, %v745_v56 }
 0x306   : > { %v754_v9 = vmul.f32 %v750_v16, %v1884_v60  ;;  %v814_v16 = vmul.f32 %v1995_v45, %v1905_v14 }
 0x308   : > { %v756_v18 = vadd.f32 %v754_v9, %v752_v17  ;;  %v800_v19 = vpop.permute.xlu1 %799  ;;  %v542_v32 = vpop.permute.xlu0 %541 }
 0x30a   : > { %v1442_v20 = vpack.c.bf16 %v756_v18, %v756_v18 }
 0x30c   : > { %1400 = vst.msk [vmem:[%s1898_s10 + $0x10] sm:$0xf] %vm492_vm3, %v1442_v20  ;;  %v806_v21 = vpop.permute.xlu1 %805 }
 0x30d   : > { %v811_v22 = vsel %vm475_vm4, %v800_v19, %v806_v21  ;;  %v884_v21 = vmul.f32 %v2002_v46, %v1905_v14 }
 0x30e   : > { %v815_v61 = vmul.f32 %v811_v22, %v1884_v60 }
 0x310   : > { %v817_v24 = vadd.f32 %v815_v61, %v813_v23  ;;  %v870_v49 = vpop.permute.xlu1 %869 }
 0x312   : > { %v1444_v50 = vpack.c.bf16 %v817_v24, %v817_v24 }
 0x314   : > { %1404 = vst.msk [vmem:[%s2024_s18 + $0x10] sm:$0xf] %vm492_vm3, %v1444_v50  ;;  %v876_v52 = vpop.permute.xlu1 %875  ;;  %v945_v50 = vmul.f32 %v2008_v12, %v1905_v14  ;;  %v1005_v14 = vld [vmem:[%s1898_s10] sm:$0xff] (%p1723_p5)  }
 0x315   : > { %v881_v25 = vsel %vm475_vm4, %v870_v49, %v876_v52  ;;  %1006 = vst [vmem:[%s989_s19] sm:$0xff] (%p1723_p5), %v1005_v14  }
 0x316   : > { %v885_v27 = vmul.f32 %v881_v25, %v1884_v60 }
 0x318   : > { %v887_v30 = vadd.f32 %v885_v27, %v883_v26 }
 0x319   : > { %v931_v33 = vpop.permute.xlu1 %930 }
 0x31a   : > { %v1446_v28 = vpack.c.bf16 %v887_v30, %v887_v30 }
 0x31c   : > { %1410 = vst.msk [vmem:[%s1898_s10 + $0x18] sm:$0xf] %vm492_vm3, %v1446_v28 }
 0x31d   : > { %v536_v34 = vpop.permute.xlu1 %535  ;;  %v610_v36 = vpop.permute.xlu0 %609 }
 0x31e   : > { %v546_v37 = vsel %vm475_vm4, %v536_v34, %v542_v32 }
 0x31f   : > { %v550_v40 = vmul.f32 %v546_v37, %v1908_v15 }
 0x321   : > { %v552_v42 = vadd.f32 %v550_v40, %v548_v39  ;;  %v616_v31 = vpop.permute.xlu1 %615  ;;  %v671_v43 = vpop.permute.xlu0 %670 }
 0x322   : > { %v620_v47 = vsel %vm475_vm4, %v610_v36, %v616_v31 }
 0x323   : > { %v1435_v48 = vpack.c.bf16 %v552_v42, %v552_v42  ;;  %v624_v51 = vmul.f32 %v620_v47, %v1908_v15 }
 0x325   : > { %562 = vst.msk [vmem:[%s2024_s18 + $0x4] sm:$0xf] %vm492_vm3, %v1435_v48  ;;  %v626_v53 = vadd.f32 %v624_v51, %v622_v55  ;;  %v937_v54 = vpop.permute.xlu1 %936  ;;  %v677_v29 = vpop.permute.xlu0 %676 }
 0x326   : > { %v942_v58 = vsel %vm475_vm4, %v931_v33, %v937_v54  ;;  %v681_v6 = vsel %vm475_vm4, %v671_v43, %v677_v29 }
 0x327   : > { %v1439_v62 = vpack.c.bf16 %v626_v53, %v626_v53  ;;  %v946_v63 = vmul.f32 %v942_v58, %v1884_v60  ;;  %v685_v13 = vmul.f32 %v681_v6, %v1908_v15 }
 0x329   : > { %1391 = vst.msk [vmem:[%s1898_s10 + $0xc] sm:$0xf] %vm492_vm3, %v1439_v62  ;;  %v948_v0 = vadd.f32 %v946_v63, %v944_v38  ;;  %v687_v1 = vadd.f32 %v685_v13, %v683_v57  ;;  %v962_v2 = vpop.permute.xlu1 %961  ;;  %v741_v41 = vpop.permute.xlu0 %740 }
 0x32a   : > { %1416 = vst.msk [vmem:[%s1794_s17 + $0x18] sm:$0xf] %vm492_vm3, %v962_v2 }
 0x32b   : > { %v1448_v3 = vpack.c.bf16 %v948_v0, %v948_v0  ;;  %v1441_v4 = vpack.c.bf16 %v687_v1, %v687_v1 }
 0x32d   : > { %1414 = vst.msk [vmem:[%s2024_s18 + $0x18] sm:$0xf] %vm492_vm3, %v1448_v3  ;;  %1395 = vst.msk [vmem:[%s2024_s18 + $0xc] sm:$0xf] %vm492_vm3, %v1441_v4  ;;  %v747_v59 = vpop.permute.xlu0 %746 }
 0x32e   : > { %v751_v60 = vsel %vm475_vm4, %v741_v41, %v747_v59 }
 0x32f   : > { %v755_v5 = vmul.f32 %v751_v60, %v1908_v15 }
 0x331   : > { %v757_v7 = vadd.f32 %v755_v5, %v753_v35  ;;  %v802_v8 = vpop.permute.xlu0 %801 }
 0x333   : > { %v1443_v10 = vpack.c.bf16 %v757_v7, %v757_v7 }
 0x335   : > { %1401 = vst.msk [vmem:[%s1898_s10 + $0x14] sm:$0xf] %vm492_vm3, %v1443_v10  ;;  %v808_v11 = vpop.permute.xlu0 %807 }
 0x336   : > { %v812_v56 = vsel %vm475_vm4, %v802_v8, %v808_v11 }
 0x337   : > { %v816_v17 = vmul.f32 %v812_v56, %v1908_v15 }
 0x339   : > { %v818_v9 = vadd.f32 %v816_v17, %v814_v16  ;;  %v872_v18 = vpop.permute.xlu0 %871 }
 0x33b   : > { %v1445_v19 = vpack.c.bf16 %v818_v9, %v818_v9 }
 0x33c   : > { %v1013_v12 = vld [vmem:[%s1898_s10 + $0x10] sm:$0xff] (%p1723_p5)  }
 0x33d   : > { %1405 = vst.msk [vmem:[%s2024_s18 + $0x14] sm:$0xf] %vm492_vm3, %v1445_v19  ;;  %v878_v44 = vpop.permute.xlu0 %877  ;;  %1014 = vst [vmem:[%s989_s19 + $0x20] sm:$0xff] (%p1723_p5), %v1013_v12  }
 0x33e   : > { %v882_v20 = vsel %vm475_vm4, %v872_v18, %v878_v44 }
 0x33f   : > { %v886_v22 = vmul.f32 %v882_v20, %v1908_v15 }
 0x341   : > { %v888_v23 = vadd.f32 %v886_v22, %v884_v21  ;;  %v933_v61 = vpop.permute.xlu0 %932 }
 0x343   : > { %v1447_v45 = vpack.c.bf16 %v888_v23, %v888_v23 }
 0x345   : > { %1411 = vst.msk [vmem:[%s1898_s10 + $0x1c] sm:$0xf] %vm492_vm3, %v1447_v45  ;;  %v939_v24 = vpop.permute.xlu0 %938 }
 0x346   : > { %v943_v49 = vsel %vm475_vm4, %v933_v61, %v939_v24 }
 0x347   : > { %v947_v52 = vmul.f32 %v943_v49, %v1908_v15  ;;  %984 = sbr.rel (!%p1723_p5) target bundleno = 846 (0x34e), region = 44  ;;  %v1009_v15 = vld [vmem:[%s1898_s10 + $0x8] sm:$0xff] (%p1723_p5)  }
 0x348   : > { %1010 = vst [vmem:[%s989_s19 + $0x10] sm:$0xff] (%p1723_p5), %v1009_v15  }
 0x349   : > { %v949_v25 = vadd.f32 %v947_v52, %v945_v50  ;;  %v964_v26 = vpop.permute.xlu0 %963 }
 0x34a   : > { %1417 = vst.msk [vmem:[%s1794_s17 + $0x1c] sm:$0xf] %vm492_vm3, %v964_v26 }
 0x34b   : > { %v1449_v46 = vpack.c.bf16 %v949_v25, %v949_v25 }
 0x34c   : > { %v1017_v27 = vld [vmem:[%s1898_s10 + $0x18] sm:$0xff] (%p1723_p5)  }
 0x34d   : > { %1415 = vst.msk [vmem:[%s2024_s18 + $0x1c] sm:$0xf] %vm492_vm3, %v1449_v46  ;;  %1018 = vst [vmem:[%s989_s19 + $0x30] sm:$0xff] (%p1723_p5), %v1017_v27  }
 0x34e PF: > { %1059 = sbr.rel (!%p1723_p5) target bundleno = 854 (0x356), region = 85  ;;  %s1425_s22 = sshll.u32 (%p1723_p5), %s1608_s27, 4  ;;  %v1080_v30 = vld [vmem:[%s2024_s18] sm:$0xff] (%p1723_p5)   ;;  %v1084_v32 = vld [vmem:[%s2024_s18 + $0x8] sm:$0xff] (%p1723_p5)   ;;  %v1088_v33 = vld [vmem:[%s2024_s18 + $0x10] sm:$0xff] (%p1723_p5)  }
 0x34f   : > { %s1062_s10 = sadd.s32 (%p1723_p5), %s1425_s22, %s1743_s21 }
 0x350   : > { %s1426_s11 = sshll.u32 (%p1723_p5), %s1062_s10, 2 }
 0x351   : > { %s1064_s15 = scalar_lea.vmem (%p1723_p5), %s2166_s6, %s1426_s11 }
 0x352   : > { %1081 = vst [vmem:[%s1064_s15] sm:$0xff] (%p1723_p5), %v1080_v30   ;;  %1085 = vst [vmem:[%s1064_s15 + $0x10] sm:$0xff] (%p1723_p5), %v1084_v32  }
 0x353   : > { %1089 = vst [vmem:[%s1064_s15 + $0x20] sm:$0xff] (%p1723_p5), %v1088_v33  }
 0x354   : > { %v1092_v28 = vld [vmem:[%s2024_s18 + $0x18] sm:$0xff] (%p1723_p5)  }
 0x355   : > { %1093 = vst [vmem:[%s1064_s15 + $0x30] sm:$0xff] %v1092_v28  }
 0x356 PF: > { %1134 = sbr.rel (!%p1723_p5) target bundleno = 861 (0x35d), region = 126  ;;  %s1428_s18 = sshll.u32 (%p1723_p5), %s1608_s27, 4  ;;  %v1155_v34 = vld [vmem:[%s1794_s17] sm:$0xff] (%p1723_p5)   ;;  %v1159_v36 = vld [vmem:[%s1794_s17 + $0x8] sm:$0xff] (%p1723_p5)   ;;  %v1163_v37 = vld [vmem:[%s1794_s17 + $0x10] sm:$0xff] (%p1723_p5)  }
 0x357   : > { %s1137_s26 = sadd.s32 (%p1723_p5), %s1428_s18, %s1743_s21  ;;  %v1167_v39 = vld [vmem:[%s1794_s17 + $0x18] sm:$0xff] (%p1723_p5)  }
 0x358   : > { %s1429_s14 = sshll.u32 (%p1723_p5), %s1137_s26, 2 }
 0x359   : > { %s1139_s19 = scalar_lea.vmem (%p1723_p5), %s2167_s7, %s1429_s14 }
 0x35a   : > { %1156 = vst [vmem:[%s1139_s19] sm:$0xff] (%p1723_p5), %v1155_v34   ;;  %1160 = vst [vmem:[%s1139_s19 + $0x10] sm:$0xff] (%p1723_p5), %v1159_v36  }
 0x35b   : > { %1164 = vst [vmem:[%s1139_s19 + $0x20] sm:$0xff] (%p1723_p5), %v1163_v37   ;;  %1168 = vst [vmem:[%s1139_s19 + $0x30] sm:$0xff] (%p1723_p5), %v1167_v39  }
 0x35d PF: > { %s18_s30 = sadd.s32 1, %s1620_s30   ;;  %s2179_s24 = smov %s1600_s25 }
 0x35e   : > { %p15_p11 = scmp.ge.s32.totalorder %s18_s30, 6   ;;  %s2180_s25 = smov %s1734_s16 }
 0x35f   : > { %s2181_s26 = smov %s1612_s28  ;;  %s2182_s27 = smov %s1616_s29 }
 0x360   : > { %s2183_s28 = smov %s2186_s8  ;;  %s2184_s29 = smov %s2190_s9 }
 0x361   :  { %17 = sbr.rel (!%p15_p11) target bundleno = 4 (0x4), region = 232 }

</bundles_post_ra>
